<compile_context>
chip_gen: v5e
topology: v5e:2x2
jax: 0.10.0
libtpu: 0.0.40
codegen_flags: <defaults>
</compile_context>

<pallas_src>
import functools

import numpy as np
import jax
import jax.numpy as jnp
from jax.experimental import pallas as pl
from jax.experimental.pallas import tpu as pltpu


def _reflect_index(i, n):
    """PyTorch-style 'reflect' (edge not repeated) for |pad| < n."""
    i = np.abs(np.asarray(i, dtype=np.int64))
    return np.where(i >= n, 2 * (n - 1) - i, i)


def _single_feature_kernel(x_ref, t1_ref, t2_ref, p_ref, gamma_t_ref, beta_t_ref,
                           bias2_t_ref, o_ref, y1p_ref, *, N, H, W, Cout, eps):
    WC = W * Cout
    stride = y1p_ref.shape[0] // N          # per-image row stride (>= H+2, mult of 8)

    # ---------------- conv1: ONE full-width matmul ----------------
    # Wrapper folded H im2row (K row taps concatenated), W reflect pad, W taps
    # and the channel contraction into t1; contraction zero-padded to 256.
    y1 = jnp.dot(x_ref[...], t1_ref[...], preferred_element_type=jnp.float32)   # (N*H, WC)

    # ---------- BatchNorm2d (batch statistics), single pass, one P matmul ----------
    s = jnp.sum(y1, axis=0, keepdims=True)                       # (1, WC)
    ss = jnp.sum(y1 * y1, axis=0, keepdims=True)                 # (1, WC)
    stats_lhs = jnp.concatenate([s, ss, jnp.zeros((6, WC), jnp.float32)], axis=0)
    stats = jnp.dot(stats_lhs, p_ref[...], preferred_element_type=jnp.float32)  # (8, WC)
    inv_cnt = 1.0 / float(N * H * W)
    mean_t = stats[0:1, :] * inv_cnt
    ex2_t = stats[1:2, :] * inv_cnt
    var_t = ex2_t - mean_t * mean_t          # biased batch variance
    # TODO(synk): use a centered two-pass variance for real activations
    # (single-pass E[x^2]-E[x]^2 cancels catastrophically when |mean| >> std).
    scale_t = gamma_t_ref[...] * jax.lax.rsqrt(var_t + eps)
    shift_t = beta_t_ref[...] - mean_t * scale_t
    y1n = y1 * scale_t + shift_t             # (N*H, WC)

    # ------- H-direction reflect pad into VMEM (W pad is folded into t2) -------
    # Each image owns `stride` rows: [h=-1 | h=0..H-1 | h=H | unused gap].
    # Pad rows are written directly from the register value (no store->load dep).
    for n in range(N):
        base = n * stride
        y1p_ref[base + 1:base + 1 + H, :] = y1n[n * H:(n + 1) * H, :]
        y1p_ref[base:base + 1, :] = y1n[n * H + 1:n * H + 2, :]                       # h=-1 <- h=1
        y1p_ref[base + H + 1:base + H + 2, :] = y1n[n * H + H - 2:n * H + H - 1, :]   # h=H  <- h=H-2
    # Zero the (discarded) gap rows so the batched conv2 never reads garbage bits.
    if stride > H + 2:
        for n in range(N - 1):
            y1p_ref[n * stride + H + 2:(n + 1) * stride, :] = (
                jnp.zeros((stride - (H + 2), WC), jnp.float32))

    # ---------------- conv2: 3 batched row-tap matmuls + bias ----------------
    nrows = (N - 1) * stride + H             # covers every image's H output rows
    acc = jnp.dot(y1p_ref[0:nrows, :], t2_ref[0], preferred_element_type=jnp.float32)
    for kh in range(1, 3):
        acc = acc + jnp.dot(y1p_ref[kh:kh + nrows, :], t2_ref[kh],
                            preferred_element_type=jnp.float32)
    acc = acc + bias2_t_ref[...]             # bias broadcast hoisted (done once)
    for n in range(N):                       # 8-aligned slices; lane-dense stores
        o_ref[n * H:(n + 1) * H, :] = acc[n * stride:n * stride + H, :]


def make_single_feature_params(w1, gamma, beta, w2, bias2, *, W,
                               kernel_size=3, dilation=1):
    """Precompute (once, outside jit) the packed weights/constants.

    w1: (K,K,Cin,Cout) HWIO; w2: (3,3,Cout,Cout) HWIO; gamma/beta/bias2: (Cout,).
    """
    K = kernel_size
    w1f = np.asarray(w1, np.float32)
    w2f = np.asarray(w2, np.float32)
    Cin, Cout = w1f.shape[2], w1f.shape[3]
    f = K + (K - 1) * (dilation - 1)
    pad1 = (f - 1) // 2
    WC = W * Cout

    # conv1: fold W reflect pad + W taps + channel contraction into one
    # block-Toeplitz matrix per row tap, stack taps along the contraction.
    t1_blocks = []
    for kh in range(K):
        blk = np.zeros((W * Cin, WC), np.float32)
        for kw in range(K):
            sel = np.zeros((W, W), np.float32)
            w_in = _reflect_index(np.arange(W) + kw * dilation - pad1, W)
            sel[w_in, np.arange(W)] = 1.0
            blk += np.kron(sel, w1f[kh, kw])
        t1_blocks.append(blk)
    t1 = np.concatenate(t1_blocks, axis=0)                    # (K*W*Cin, WC)
    Kc = ((t1.shape[0] + 127) // 128) * 128                    # pad contraction (192 -> 256)
    t1 = np.pad(t1, ((0, Kc - t1.shape[0]), (0, 0)))

    # conv2 (3x3, pad 1, reflect): W reflect pad folded in -> t2 is (3, WC, WC).
    t2_blocks = []
    for kh in range(3):
        blk = np.zeros((WC, WC), np.float32)
        for kw in range(3):
            sel = np.zeros((W, W), np.float32)
            w_in = _reflect_index(np.arange(W) + kw - 1, W)
            sel[w_in, np.arange(W)] = 1.0
            blk += np.kron(sel, w2f[kh, kw])
        t2_blocks.append(blk)
    t2 = np.stack(t2_blocks)                                   # (3, WC, WC)

    # BN channel group-reduce/broadcast matrix (unit entries; 1/(N*H*W) applied in-kernel).
    lane_chan = np.arange(WC) % Cout
    p_mat = (lane_chan[:, None] == lane_chan[None, :]).astype(np.float32)

    gamma_t = np.tile(np.asarray(gamma, np.float32), W).reshape(1, WC)
    beta_t = np.tile(np.asarray(beta, np.float32), W).reshape(1, WC)
    bias2_t = np.tile(np.asarray(bias2, np.float32), W).reshape(1, WC)

    return dict(t1=jnp.asarray(t1), t2=jnp.asarray(t2), p=jnp.asarray(p_mat),
                gamma_t=jnp.asarray(gamma_t), beta_t=jnp.asarray(beta_t),
                bias2_t=jnp.asarray(bias2_t))


def single_feature_forward(x_nchw, t1, t2, p_mat, gamma_t, beta_t, bias2_t, *,
                           kernel_size=3, dilation=1, eps=1e-5):
    """Pallas implementation of SingleFeature.forward (NCHW in / NCHW out)."""
    N, Cin, H, W = x_nchw.shape
    K = kernel_size
    f = K + (K - 1) * (dilation - 1)
    pad1 = (f - 1) // 2
    Cout = gamma_t.shape[-1] // W
    WC = W * Cout
    Kc = t1.shape[0]

    # NCHW -> (N, H, W*Cin) lane packing. (Kept because the module interface is
    # NCHW; drop both transposes if the consumer accepts the packed layout.)
    x = jnp.transpose(x_nchw, (0, 2, 3, 1)).astype(jnp.float32).reshape(N, H, W * Cin)

    # H-direction im2row with reflect indexing: each output row carries its K
    # row taps concatenated, so conv1 is ONE matmul inside the kernel.
    taps = []
    for kh in range(K):
        idx = _reflect_index(np.arange(H) + kh * dilation - pad1, H)
        taps.append(x[:, idx, :])
    lhs = jnp.concatenate(taps, axis=-1)                        # (N, H, K*W*Cin)
    pad_cols = Kc - lhs.shape[-1]
    if pad_cols:
        lhs = jnp.pad(lhs, ((0, 0), (0, 0), (0, pad_cols)))     # contraction -> mult of 128
    lhs = lhs.reshape(N * H, Kc)

    stride = -(-(H + 2) // 8) * 8            # per-image row stride in the padded scratch
    vmem = pl.BlockSpec(memory_space=pltpu.MemorySpace.VMEM)
    out2d = pl.pallas_call(
        functools.partial(_single_feature_kernel, N=N, H=H, W=W, Cout=Cout, eps=eps),
        out_shape=jax.ShapeDtypeStruct((N * H, WC), jnp.float32),
        in_specs=[vmem] * 7,
        out_specs=vmem,
        scratch_shapes=[pltpu.VMEM((N * stride, WC), jnp.float32)],   # H-padded intermediate
    )(lhs, t1, t2, p_mat, gamma_t, beta_t, bias2_t)

    y = out2d.reshape(N, H, W, Cout)
    return jnp.transpose(y, (0, 3, 1, 2))


# ---------------- pure-JAX reference (for correctness check) ----------------
def _ref_conv_reflect(x_nhwc, w_hwio, pad, dilation, bias=None):
    xp = jnp.pad(x_nhwc, ((0, 0), (pad, pad), (pad, pad), (0, 0)), mode="reflect")
    y = jax.lax.conv_general_dilated(
        xp, w_hwio, window_strides=(1, 1), padding="VALID",
        rhs_dilation=(dilation, dilation),
        dimension_numbers=("NHWC", "HWIO", "NHWC"))
    if bias is not None:
        y = y + bias
    return y


def _ref_forward(x_nchw, w1, gamma, beta, w2, bias2, *, kernel_size=3, dilation=1, eps=1e-5):
    K = kernel_size
    f = K + (K - 1) * (dilation - 1)
    pad1 = (f - 1) // 2
    x = jnp.transpose(x_nchw, (0, 2, 3, 1)).astype(jnp.float32)
    y = _ref_conv_reflect(x, w1, pad1, dilation)
    mean = jnp.mean(y, axis=(0, 1, 2), keepdims=True)
    var = jnp.mean((y - mean) ** 2, axis=(0, 1, 2), keepdims=True)
    y = (y - mean) * jax.lax.rsqrt(var + eps) * gamma + beta
    y = _ref_conv_reflect(y, w2, 1, 1, bias=bias2)
    return jnp.transpose(y, (0, 3, 1, 2))


if __name__ == "__main__":
    # Small shapes consistent with the module: batch=2, in_ch=4, out_ch=8, 16x16 spatial.
    N, Cin, Cout, H, W = 2, 4, 8, 16, 16
    K, dilation = 3, 1

    key = jax.random.PRNGKey(0)
    k_x, k_w1, k_g, k_b, k_w2, k_bias = jax.random.split(key, 6)

    x = jax.random.normal(k_x, (N, Cin, H, W), jnp.float32)
    w1 = 0.1 * jax.random.normal(k_w1, (K, K, Cin, Cout), jnp.float32)     # HWIO
    gamma = 1.0 + 0.1 * jax.random.normal(k_g, (Cout,), jnp.float32)
    beta = 0.1 * jax.random.normal(k_b, (Cout,), jnp.float32)
    w2 = 0.1 * jax.random.normal(k_w2, (3, 3, Cout, Cout), jnp.float32)    # HWIO
    bias2 = 0.1 * jax.random.normal(k_bias, (Cout,), jnp.float32)

    # Packed weights/constants are built ONCE, outside the per-step jit.
    params = make_single_feature_params(w1, gamma, beta, w2, bias2, W=W,
                                        kernel_size=K, dilation=dilation)

    fwd = jax.jit(functools.partial(single_feature_forward,
                                    kernel_size=K, dilation=dilation))
    out = jax.block_until_ready(
        fwd(x, params["t1"], params["t2"], params["p"],
            params["gamma_t"], params["beta_t"], params["bias2_t"]))

    ref = _ref_forward(x, w1, gamma, beta, w2, bias2, kernel_size=K, dilation=dilation)
    assert out.shape == (N, Cout, H, W)
    assert jnp.allclose(out, ref, atol=1e-3, rtol=1e-3), "mismatch vs JAX reference"

    print("KERNEL_OK")
</pallas_src>

<mosaic_0001>
module attributes {stable_mosaic.version = 11 : i64} {
  func.func @_single_feature_kernel(%arg0: memref<32x256xf32, #tpu.memory_space<vmem>>, %arg1: memref<256x128xf32, #tpu.memory_space<vmem>>, %arg2: memref<3x128x128xf32, #tpu.memory_space<vmem>>, %arg3: memref<128x128xf32, #tpu.memory_space<vmem>>, %arg4: memref<1x128xf32, #tpu.memory_space<vmem>>, %arg5: memref<1x128xf32, #tpu.memory_space<vmem>>, %arg6: memref<1x128xf32, #tpu.memory_space<vmem>>, %arg7: memref<32x128xf32, #tpu.memory_space<vmem>>, %arg8: memref<48x128xf32, #tpu.memory_space<vmem>>) attributes {dimension_semantics = [], scalar_prefetch = 0 : i64, scratch_operands = 1 : i64, tpu.core_type = #tpu.core_type<tc>} {
    %c0 = arith.constant 0 : index
    %c0_0 = arith.constant 0 : index
    %0 = vector.load %arg0[%c0, %c0_0] : memref<32x256xf32, #tpu.memory_space<vmem>>, vector<32x256xf32>
    %c0_1 = arith.constant 0 : index
    %c0_2 = arith.constant 0 : index
    %1 = vector.load %arg1[%c0_1, %c0_2] : memref<256x128xf32, #tpu.memory_space<vmem>>, vector<256x128xf32>
    %cst = arith.constant dense<0.000000e+00> : vector<32x128xf32>
    %2 = tpu.matmul %0, %1, %cst {dimension_numbers = #tpu.dot_dimension_numbers<[1], [0], [0], [1], [0, 0, 1, 1], [], []>} : vector<32x256xf32>, vector<256x128xf32>, vector<32x128xf32> -> vector<32x128xf32>
    %cst_3 = arith.constant dense<0.000000e+00> : vector<128xf32>
    %3 = vector.multi_reduction <add>, %2, %cst_3 [0] : vector<32x128xf32> to vector<128xf32>
    %4 = vector.shape_cast %3 : vector<128xf32> to vector<1x128xf32>
    %5 = arith.mulf %2, %2 : vector<32x128xf32>
    %cst_4 = arith.constant dense<0.000000e+00> : vector<128xf32>
    %6 = vector.multi_reduction <add>, %5, %cst_4 [0] : vector<32x128xf32> to vector<128xf32>
    %7 = vector.shape_cast %6 : vector<128xf32> to vector<1x128xf32>
    %cst_5 = arith.constant 0.000000e+00 : f32
    %8 = vector.broadcast %cst_5 : f32 to vector<6x128xf32>
    %9 = tpu.concatenate %4, %7, %8 in 0 : vector<1x128xf32>, vector<1x128xf32>, vector<6x128xf32> -> vector<8x128xf32>
    %c0_6 = arith.constant 0 : index
    %c0_7 = arith.constant 0 : index
    %10 = vector.load %arg3[%c0_6, %c0_7] : memref<128x128xf32, #tpu.memory_space<vmem>>, vector<128x128xf32>
    %cst_8 = arith.constant dense<0.000000e+00> : vector<8x128xf32>
    %11 = tpu.matmul %9, %10, %cst_8 {dimension_numbers = #tpu.dot_dimension_numbers<[1], [0], [0], [1], [0, 0, 1, 1], [], []>} : vector<8x128xf32>, vector<128x128xf32>, vector<8x128xf32> -> vector<8x128xf32>
    %12 = vector.extract_strided_slice %11 {offsets = [0, 0], sizes = [1, 128], strides = [1, 1]} : vector<8x128xf32> to vector<1x128xf32>
    %cst_9 = arith.constant 0.001953125 : f32
    %13 = vector.broadcast %cst_9 : f32 to vector<1x128xf32>
    %14 = arith.mulf %12, %13 : vector<1x128xf32>
    %15 = vector.extract_strided_slice %11 {offsets = [1, 0], sizes = [1, 128], strides = [1, 1]} : vector<8x128xf32> to vector<1x128xf32>
    %cst_10 = arith.constant 0.001953125 : f32
    %16 = vector.broadcast %cst_10 : f32 to vector<1x128xf32>
    %17 = arith.mulf %15, %16 : vector<1x128xf32>
    %18 = arith.mulf %14, %14 : vector<1x128xf32>
    %19 = arith.subf %17, %18 : vector<1x128xf32>
    %c0_11 = arith.constant 0 : index
    %c0_12 = arith.constant 0 : index
    %20 = vector.load %arg4[%c0_11, %c0_12] : memref<1x128xf32, #tpu.memory_space<vmem>>, vector<1x128xf32>
    %cst_13 = arith.constant 9.99999974E-6 : f32
    %21 = vector.broadcast %cst_13 : f32 to vector<1x128xf32>
    %22 = arith.addf %19, %21 : vector<1x128xf32>
    %23 = math.rsqrt %22 : vector<1x128xf32>
    %24 = arith.mulf %20, %23 : vector<1x128xf32>
    %c0_14 = arith.constant 0 : index
    %c0_15 = arith.constant 0 : index
    %25 = vector.load %arg5[%c0_14, %c0_15] : memref<1x128xf32, #tpu.memory_space<vmem>>, vector<1x128xf32>
    %26 = arith.mulf %14, %24 : vector<1x128xf32>
    %27 = arith.subf %25, %26 : vector<1x128xf32>
    %28 = vector.broadcast %24 : vector<1x128xf32> to vector<32x128xf32>
    %29 = arith.mulf %2, %28 : vector<32x128xf32>
    %30 = vector.broadcast %27 : vector<1x128xf32> to vector<32x128xf32>
    %31 = arith.addf %29, %30 : vector<32x128xf32>
    %32 = vector.extract_strided_slice %31 {offsets = [0, 0], sizes = [16, 128], strides = [1, 1]} : vector<32x128xf32> to vector<16x128xf32>
    %c1 = arith.constant 1 : index
    %c0_16 = arith.constant 0 : index
    %33 = vector.load %arg8[%c1, %c0_16] : memref<48x128xf32, #tpu.memory_space<vmem>>, vector<16x128xf32>
    tpu.vector_store %arg8[%c1, %c0_16], %32 {strides = array<i32>} : memref<48x128xf32, #tpu.memory_space<vmem>>, vector<16x128xf32>,
    %34 = vector.extract_strided_slice %31 {offsets = [1, 0], sizes = [1, 128], strides = [1, 1]} : vector<32x128xf32> to vector<1x128xf32>
    %c0_17 = arith.constant 0 : index
    %c0_18 = arith.constant 0 : index
    %35 = vector.load %arg8[%c0_17, %c0_18] : memref<48x128xf32, #tpu.memory_space<vmem>>, vector<1x128xf32>
    tpu.vector_store %arg8[%c0_17, %c0_18], %34 {strides = array<i32>} : memref<48x128xf32, #tpu.memory_space<vmem>>, vector<1x128xf32>,
    %36 = vector.extract_strided_slice %31 {offsets = [14, 0], sizes = [1, 128], strides = [1, 1]} : vector<32x128xf32> to vector<1x128xf32>
    %c17 = arith.constant 17 : index
    %c0_19 = arith.constant 0 : index
    %37 = vector.load %arg8[%c17, %c0_19] : memref<48x128xf32, #tpu.memory_space<vmem>>, vector<1x128xf32>
    tpu.vector_store %arg8[%c17, %c0_19], %36 {strides = array<i32>} : memref<48x128xf32, #tpu.memory_space<vmem>>, vector<1x128xf32>,
    %38 = vector.extract_strided_slice %31 {offsets = [16, 0], sizes = [16, 128], strides = [1, 1]} : vector<32x128xf32> to vector<16x128xf32>
    %c25 = arith.constant 25 : index
    %c0_20 = arith.constant 0 : index
    %39 = vector.load %arg8[%c25, %c0_20] : memref<48x128xf32, #tpu.memory_space<vmem>>, vector<16x128xf32>
    tpu.vector_store %arg8[%c25, %c0_20], %38 {strides = array<i32>} : memref<48x128xf32, #tpu.memory_space<vmem>>, vector<16x128xf32>,
    %40 = vector.extract_strided_slice %31 {offsets = [17, 0], sizes = [1, 128], strides = [1, 1]} : vector<32x128xf32> to vector<1x128xf32>
    %c24 = arith.constant 24 : index
    %c0_21 = arith.constant 0 : index
    %41 = vector.load %arg8[%c24, %c0_21] : memref<48x128xf32, #tpu.memory_space<vmem>>, vector<1x128xf32>
    tpu.vector_store %arg8[%c24, %c0_21], %40 {strides = array<i32>} : memref<48x128xf32, #tpu.memory_space<vmem>>, vector<1x128xf32>,
    %42 = vector.extract_strided_slice %31 {offsets = [30, 0], sizes = [1, 128], strides = [1, 1]} : vector<32x128xf32> to vector<1x128xf32>
    %c41 = arith.constant 41 : index
    %c0_22 = arith.constant 0 : index
    %43 = vector.load %arg8[%c41, %c0_22] : memref<48x128xf32, #tpu.memory_space<vmem>>, vector<1x128xf32>
    tpu.vector_store %arg8[%c41, %c0_22], %42 {strides = array<i32>} : memref<48x128xf32, #tpu.memory_space<vmem>>, vector<1x128xf32>,
    %cst_23 = arith.constant 0.000000e+00 : f32
    %44 = vector.broadcast %cst_23 : f32 to vector<6x128xf32>
    %c18 = arith.constant 18 : index
    %c0_24 = arith.constant 0 : index
    %45 = vector.load %arg8[%c18, %c0_24] : memref<48x128xf32, #tpu.memory_space<vmem>>, vector<6x128xf32>
    tpu.vector_store %arg8[%c18, %c0_24], %44 {strides = array<i32>} : memref<48x128xf32, #tpu.memory_space<vmem>>, vector<6x128xf32>,
    %c0_25 = arith.constant 0 : index
    %c0_26 = arith.constant 0 : index
    %46 = vector.load %arg8[%c0_25, %c0_26] : memref<48x128xf32, #tpu.memory_space<vmem>>, vector<40x128xf32>
    %c0_27 = arith.constant 0 : index
    %c0_28 = arith.constant 0 : index
    %c0_29 = arith.constant 0 : index
    %47 = vector.load %arg2[%c0_27, %c0_28, %c0_29] : memref<3x128x128xf32, #tpu.memory_space<vmem>>, vector<1x128x128xf32>
    %48 = vector.shape_cast %47 : vector<1x128x128xf32> to vector<128x128xf32>
    %cst_30 = arith.constant dense<0.000000e+00> : vector<40x128xf32>
    %49 = tpu.matmul %46, %48, %cst_30 {dimension_numbers = #tpu.dot_dimension_numbers<[1], [0], [0], [1], [0, 0, 1, 1], [], []>} : vector<40x128xf32>, vector<128x128xf32>, vector<40x128xf32> -> vector<40x128xf32>
    %c1_31 = arith.constant 1 : index
    %c0_32 = arith.constant 0 : index
    %50 = vector.load %arg8[%c1_31, %c0_32] : memref<48x128xf32, #tpu.memory_space<vmem>>, vector<40x128xf32>
    %c1_33 = arith.constant 1 : index
    %c0_34 = arith.constant 0 : index
    %c0_35 = arith.constant 0 : index
    %51 = vector.load %arg2[%c1_33, %c0_34, %c0_35] : memref<3x128x128xf32, #tpu.memory_space<vmem>>, vector<1x128x128xf32>
    %52 = vector.shape_cast %51 : vector<1x128x128xf32> to vector<128x128xf32>
    %cst_36 = arith.constant dense<0.000000e+00> : vector<40x128xf32>
    %53 = tpu.matmul %50, %52, %cst_36 {dimension_numbers = #tpu.dot_dimension_numbers<[1], [0], [0], [1], [0, 0, 1, 1], [], []>} : vector<40x128xf32>, vector<128x128xf32>, vector<40x128xf32> -> vector<40x128xf32>
    %54 = arith.addf %49, %53 : vector<40x128xf32>
    %c2 = arith.constant 2 : index
    %c0_37 = arith.constant 0 : index
    %55 = vector.load %arg8[%c2, %c0_37] : memref<48x128xf32, #tpu.memory_space<vmem>>, vector<40x128xf32>
    %c2_38 = arith.constant 2 : index
    %c0_39 = arith.constant 0 : index
    %c0_40 = arith.constant 0 : index
    %56 = vector.load %arg2[%c2_38, %c0_39, %c0_40] : memref<3x128x128xf32, #tpu.memory_space<vmem>>, vector<1x128x128xf32>
    %57 = vector.shape_cast %56 : vector<1x128x128xf32> to vector<128x128xf32>
    %cst_41 = arith.constant dense<0.000000e+00> : vector<40x128xf32>
    %58 = tpu.matmul %55, %57, %cst_41 {dimension_numbers = #tpu.dot_dimension_numbers<[1], [0], [0], [1], [0, 0, 1, 1], [], []>} : vector<40x128xf32>, vector<128x128xf32>, vector<40x128xf32> -> vector<40x128xf32>
    %59 = arith.addf %54, %58 : vector<40x128xf32>
    %c0_42 = arith.constant 0 : index
    %c0_43 = arith.constant 0 : index
    %60 = vector.load %arg6[%c0_42, %c0_43] : memref<1x128xf32, #tpu.memory_space<vmem>>, vector<1x128xf32>
    %61 = vector.broadcast %60 : vector<1x128xf32> to vector<40x128xf32>
    %62 = arith.addf %59, %61 : vector<40x128xf32>
    %63 = vector.extract_strided_slice %62 {offsets = [0, 0], sizes = [16, 128], strides = [1, 1]} : vector<40x128xf32> to vector<16x128xf32>
    %c0_44 = arith.constant 0 : index
    %c0_45 = arith.constant 0 : index
    %64 = vector.load %arg7[%c0_44, %c0_45] : memref<32x128xf32, #tpu.memory_space<vmem>>, vector<16x128xf32>
    tpu.vector_store %arg7[%c0_44, %c0_45], %63 {strides = array<i32>} : memref<32x128xf32, #tpu.memory_space<vmem>>, vector<16x128xf32>,
    %65 = vector.extract_strided_slice %62 {offsets = [24, 0], sizes = [16, 128], strides = [1, 1]} : vector<40x128xf32> to vector<16x128xf32>
    %c16 = arith.constant 16 : index
    %c0_46 = arith.constant 0 : index
    %66 = vector.load %arg7[%c16, %c0_46] : memref<32x128xf32, #tpu.memory_space<vmem>>, vector<16x128xf32>
    tpu.vector_store %arg7[%c16, %c0_46], %65 {strides = array<i32>} : memref<32x128xf32, #tpu.memory_space<vmem>>, vector<16x128xf32>,
    return
  }
}

</mosaic_0001>

<bundles_post_ra>
// kernel: single_feature_forward.1
= control target key start
LH: loop header
LB: loop body
LE: loop exit
PB: predicated region body
PF: predicated region fallthrough
CT: control target
= control target key end

     0   :  { %vm146_vm0 = vcmask 1040384   ;;  %vm148_vm1 = vcmask 1041408   ;;  %s928_s1 = inlined_call_operand.vmem [shape: f32[256,128], index: 1, kind: input, shape index: {}]   ;;  %s929_s0 = inlined_call_operand.vmem [shape: f32[32,256], index: 0, kind: input, shape index: {}]   ;;  %s930_s3 = inlined_call_operand.vmem [shape: f32[128,128], index: 3, kind: input, shape index: {}]   ;;  %s931_s2 = inlined_call_operand.vmem [shape: f32[3,128,128], index: 2, kind: input, shape index: {}]   ;;  %s932_s4 = inlined_call_operand.vmem [shape: f32[1,128], index: 4, kind: input, shape index: {}]   ;;  %s933_s5 = inlined_call_operand.vmem [shape: f32[1,128], index: 5, kind: input, shape index: {}]   ;;  %s934_s6 = inlined_call_operand.vmem [shape: f32[1,128], index: 6, kind: input, shape index: {}]   ;;  %s935_s7 = inlined_call_operand.vmem [shape: f32[32,128], index: 7, kind: output, shape index: {}]  }
   0x1   :  { %v49_v0 = vld [vmem:[%s928_s1 + $0x78] sm:$0xff]  ;;  %v48_v1 = vld [vmem:[%s928_s1 + $0x70] sm:$0xff]  ;;  %v47_v3 = vld [vmem:[%s928_s1 + $0x68] sm:$0xff] }
   0x2   :  { %66 = vmatpush.msra.mxu2 %v49_v0  ;;  %v65_v2 = vld [vmem:[%s928_s1 + $0xf8] sm:$0xff]  ;;  %v64_v4 = vld [vmem:[%s928_s1 + $0xf0] sm:$0xff]  ;;  %v63_v5 = vld [vmem:[%s928_s1 + $0xe8] sm:$0xff] }
   0x3   :  { %95 = vmatpush.msra.mxu1 %v65_v2  ;;  %v46_v6 = vld [vmem:[%s928_s1 + $0x60] sm:$0xff]  ;;  %v45_v8 = vld [vmem:[%s928_s1 + $0x58] sm:$0xff]  ;;  %v44_v10 = vld [vmem:[%s928_s1 + $0x50] sm:$0xff] }
   0x4   :  { %67 = vmatpush.msra.mxu2 %v48_v1  ;;  %v62_v7 = vld [vmem:[%s928_s1 + $0xe0] sm:$0xff]  ;;  %v61_v9 = vld [vmem:[%s928_s1 + $0xd8] sm:$0xff]  ;;  %v60_v11 = vld [vmem:[%s928_s1 + $0xd0] sm:$0xff] }
   0x5   :  { %96 = vmatpush.msra.mxu1 %v64_v4  ;;  %v43_v12 = vld [vmem:[%s928_s1 + $0x48] sm:$0xff]  ;;  %v42_v14 = vld [vmem:[%s928_s1 + $0x40] sm:$0xff]  ;;  %v41_v16 = vld [vmem:[%s928_s1 + $0x38] sm:$0xff] }
   0x6   :  { %68 = vmatpush.msra.mxu2 %v47_v3  ;;  %v59_v13 = vld [vmem:[%s928_s1 + $0xc8] sm:$0xff]  ;;  %v58_v15 = vld [vmem:[%s928_s1 + $0xc0] sm:$0xff]  ;;  %v57_v17 = vld [vmem:[%s928_s1 + $0xb8] sm:$0xff] }
   0x7   :  { %97 = vmatpush.msra.mxu1 %v63_v5  ;;  %v40_v18 = vld [vmem:[%s928_s1 + $0x30] sm:$0xff]  ;;  %v39_v20 = vld [vmem:[%s928_s1 + $0x28] sm:$0xff]  ;;  %v38_v22 = vld [vmem:[%s928_s1 + $0x20] sm:$0xff] }
   0x8   :  { %69 = vmatpush.msra.mxu2 %v46_v6  ;;  %v56_v19 = vld [vmem:[%s928_s1 + $0xb0] sm:$0xff]  ;;  %v55_v21 = vld [vmem:[%s928_s1 + $0xa8] sm:$0xff]  ;;  %v54_v23 = vld [vmem:[%s928_s1 + $0xa0] sm:$0xff] }
   0x9   :  { %98 = vmatpush.msra.mxu1 %v62_v7  ;;  %v37_v24 = vld [vmem:[%s928_s1 + $0x18] sm:$0xff]  ;;  %v36_v26 = vld [vmem:[%s928_s1 + $0x10] sm:$0xff]  ;;  %v35_v28 = vld [vmem:[%s928_s1 + $0x8] sm:$0xff] }
   0xa   :  { %70 = vmatpush.msra.mxu2 %v45_v8  ;;  %v53_v25 = vld [vmem:[%s928_s1 + $0x98] sm:$0xff]  ;;  %v52_v27 = vld [vmem:[%s928_s1 + $0x90] sm:$0xff]  ;;  %v51_v29 = vld [vmem:[%s928_s1 + $0x88] sm:$0xff] }
   0xb   :  { %99 = vmatpush.msra.mxu1 %v61_v9  ;;  %v34_v30 = vld [vmem:[%s928_s1] sm:$0xff]  ;;  %v27_v33 = vld [vmem:[%s929_s0 + $0x8] sm:$0xff]  ;;  %v28_v34 = vld [vmem:[%s929_s0 + $0x10] sm:$0xff] }
   0xc   :  { %71 = vmatpush.msra.mxu2 %v44_v10  ;;  %v26_v31 = vld [vmem:[%s929_s0] sm:$0xff]  ;;  %v29_v35 = vld [vmem:[%s929_s0 + $0x18] sm:$0xff]  ;;  %v31_v37 = vld [vmem:[%s929_s0 + $0x28] sm:$0xff] }
   0xd   :  { %100 = vmatpush.msra.mxu1 %v60_v11  ;;  %v50_v32 = vld [vmem:[%s928_s1 + $0x80] sm:$0xff]  ;;  %v32_v38 = vld [vmem:[%s929_s0 + $0x30] sm:$0xff]  ;;  %v33_v39 = vld [vmem:[%s929_s0 + $0x38] sm:$0xff] }
   0xe   :  { %72 = vmatpush.msra.mxu2 %v43_v12  ;;  %v30_v36 = vld [vmem:[%s929_s0 + $0x20] sm:$0xff]  ;;  %v165_v40 = vld [vmem:[%s930_s3 + $0x78] sm:$0xff]  ;;  %v164_v41 = vld [vmem:[%s930_s3 + $0x70] sm:$0xff] }
   0xf   :  { %101 = vmatpush.msra.mxu1 %v59_v13  ;;  %v163_v42 = vld [vmem:[%s930_s3 + $0x68] sm:$0xff]  ;;  %v162_v43 = vld [vmem:[%s930_s3 + $0x60] sm:$0xff]  ;;  %v161_v44 = vld [vmem:[%s930_s3 + $0x58] sm:$0xff] }
  0x10   :  { %73 = vmatpush.msra.mxu2 %v42_v14  ;;  %v160_v45 = vld [vmem:[%s930_s3 + $0x50] sm:$0xff]  ;;  %v159_v46 = vld [vmem:[%s930_s3 + $0x48] sm:$0xff]  ;;  %v158_v47 = vld [vmem:[%s930_s3 + $0x40] sm:$0xff] }
  0x11   :  { %102 = vmatpush.msra.mxu1 %v58_v15  ;;  %v157_v49 = vld [vmem:[%s930_s3 + $0x38] sm:$0xff]  ;;  %v156_v50 = vld [vmem:[%s930_s3 + $0x30] sm:$0xff]  ;;  %v155_v52 = vld [vmem:[%s930_s3 + $0x28] sm:$0xff] }
  0x12   :  { %74 = vmatpush.msra.mxu2 %v41_v16  ;;  %v154_v53 = vld [vmem:[%s930_s3 + $0x20] sm:$0xff]  ;;  %v153_v55 = vld [vmem:[%s930_s3 + $0x18] sm:$0xff]  ;;  %v152_v56 = vld [vmem:[%s930_s3 + $0x10] sm:$0xff] }
  0x13   :  { %103 = vmatpush.msra.mxu1 %v57_v17  ;;  %v151_v57 = vld [vmem:[%s930_s3 + $0x8] sm:$0xff]  ;;  %v150_v59 = vld [vmem:[%s930_s3] sm:$0xff] }
  0x14   :  { %75 = vmatpush.msra.mxu2 %v40_v18 }
  0x15   :  { %104 = vmatpush.msra.mxu1 %v56_v19 }
  0x16   :  { %76 = vmatpush.msra.mxu2 %v39_v20 }
  0x17   :  { %105 = vmatpush.msra.mxu1 %v55_v21 }
  0x18   :  { %77 = vmatpush.msra.mxu2 %v38_v22 }
  0x19   :  { %106 = vmatpush.msra.mxu1 %v54_v23 }
  0x1a   :  { %78 = vmatpush.msra.mxu2 %v37_v24 }
  0x1b   :  { %107 = vmatpush.msra.mxu1 %v53_v25 }
  0x1c   :  { %79 = vmatpush.msra.mxu2 %v36_v26 }
  0x1d   :  { %108 = vmatpush.msra.mxu1 %v52_v27  ;;  %v430_v27 = vld [vmem:[%s931_s2 + $0xf8] sm:$0xff] }
  0x1e   :  { %80 = vmatpush.msra.mxu2 %v35_v28  ;;  %279 = vmatpush.msra.mxu3 %v430_v27  ;;  %v429_v28 = vld [vmem:[%s931_s2 + $0xf0] sm:$0xff]  ;;  %v431_v27 = vld [vmem:[%s931_s2 + $0x100] sm:$0xff] }
  0x1f   :  { %109 = vmatpush.msra.mxu1 %v51_v29  ;;  %v428_v29 = vld [vmem:[%s931_s2 + $0xe8] sm:$0xff] }
  0x20   :  { %81 = vmatpush.msra.mxu2 %v34_v30  ;;  %280 = vmatpush.msra.mxu3 %v429_v28  ;;  %v427_v30 = vld [vmem:[%s931_s2 + $0xe0] sm:$0xff] }
  0x21   :  { %82 = vmatmul.f32.vlgmr.msra.gmra.mxu2 %v26_v31  ;;  %110 = vmatpush.msra.mxu1 %v50_v32  ;;  %v256_v31 = vld [vmem:[%s931_s2 + $0x78] sm:$0xff] }
  0x22   :  { %111 = vmatmul.f32.vlgmr.msra.gmra.mxu1 %v27_v33  ;;  %166 = vmatpush.msrb.mxu2 %v165_v40  ;;  %v714_v32 = vld [vmem:[%s931_s2 + $0x178] sm:$0xff]  ;;  %v740_v40 = vld [vmem:[%s931_s2 + $0x168] sm:$0xff] }
  0x23   :  { %281 = vmatpush.msra.mxu3 %v428_v29  ;;  %v426_v33 = vld [vmem:[%s931_s2 + $0xd8] sm:$0xff]  ;;  %310 = vmatpush.msra.mxu0 %v256_v31  ;;  %v192_v29 = vld [vmem:[%s932_s4] sm:$0x1] }
  0x24   :  { %167 = vmatpush.msrb.mxu2 %v164_v41  ;;  %447 = vmatpush.msrb.mxu1 %v714_v32  ;;  %v424_v41 = vld [vmem:[%s931_s2 + $0xc8] sm:$0xff] }
  0x25   :  { %282 = vmatpush.msra.mxu3 %v427_v30 }
  0x26   :  { %168 = vmatpush.msrb.mxu2 %v163_v42 }
  0x27   :  { %283 = vmatpush.msra.mxu3 %v426_v33  ;;  %v210_v33 = vld [vmem:[%s933_s5] sm:$0x1] }
  0x28   :  { %169 = vmatpush.msrb.mxu2 %v162_v43  ;;  %v253_v43 = vld [vmem:[%s931_s2 + $0x60] sm:$0xff] }
  0x29   :  { %85 = vmatmul.f32.gmra.mxu2 %v28_v34 }
  0x2a   :  { %114 = vmatmul.f32.gmra.mxu1 %v29_v35  ;;  %170 = vmatpush.msrb.mxu2 %v161_v44  ;;  %v255_v35 = vld [vmem:[%s931_s2 + $0x70] sm:$0xff]  ;;  %v754_v44 = vld [vmem:[%s931_s2 + $0x160] sm:$0xff] }
  0x2b   :  { %311 = vmatpush.msra.mxu0 %v255_v35 }
  0x2c   :  { %171 = vmatpush.msrb.mxu2 %v160_v45  ;;  %v423_v45 = vld [vmem:[%s931_s2 + $0xc0] sm:$0xff] }
  0x2e   :  { %172 = vmatpush.msrb.mxu2 %v159_v46 }
  0x30   :  { %173 = vmatpush.msrb.mxu2 %v158_v47  ;;  %v252_v47 = vld [vmem:[%s931_s2 + $0x58] sm:$0xff] }
  0x31   :  { %88 = vmatmul.f32.gmra.mxu2 %v30_v36  ;;  %v726_v36 = vld [vmem:[%s931_s2 + $0x170] sm:$0xff] }
  0x32   :  { %117 = vmatmul.f32.gmra.mxu1 %v31_v37  ;;  %174 = vmatpush.msrb.mxu2 %v157_v49  ;;  %v425_v37 = vld [vmem:[%s931_s2 + $0xd0] sm:$0xff]  ;;  %v422_v49 = vld [vmem:[%s931_s2 + $0xb8] sm:$0xff] }
  0x33   :  { %448 = vmatpush.msrb.mxu1 %v726_v36  ;;  %284 = vmatpush.msra.mxu3 %v425_v37 }
  0x34   :  { %175 = vmatpush.msrb.mxu2 %v156_v50 }
  0x35   :  { %449 = vmatpush.msrb.mxu1 %v740_v40  ;;  %285 = vmatpush.msra.mxu3 %v424_v41 }
  0x36   :  { %176 = vmatpush.msrb.mxu2 %v155_v52  ;;  %v779_v52 = vld [vmem:[%s931_s2 + $0x150] sm:$0xff] }
  0x37   :  { %450 = vmatpush.msrb.mxu1 %v754_v44  ;;  %286 = vmatpush.msra.mxu3 %v423_v45 }
  0x38   :  { %177 = vmatpush.msrb.mxu2 %v154_v53  ;;  %v421_v53 = vld [vmem:[%s931_s2 + $0xb0] sm:$0xff] }
  0x39   :  { %91 = vmatmul.f32.gmra.mxu2 %v32_v38  ;;  %287 = vmatpush.msra.mxu3 %v422_v49 }
  0x3a   :  { %120 = vmatmul.f32.gmra.mxu1 %v33_v39  ;;  %178 = vmatpush.msrb.mxu2 %v153_v55  ;;  %v254_v39 = vld [vmem:[%s931_s2 + $0x68] sm:$0xff] }
  0x3b   :  { %312 = vmatpush.msra.mxu0 %v254_v39  ;;  %v250_v55 = vld [vmem:[%s931_s2 + $0x48] sm:$0xff]  ;;  %288 = vmatpush.msra.mxu3 %v421_v53 }
  0x3c   :  { %179 = vmatpush.msrb.mxu2 %v152_v56  ;;  %v793_v56 = vld [vmem:[%s931_s2 + $0x148] sm:$0xff] }
  0x3d   :  { %313 = vmatpush.msra.mxu0 %v253_v43 }
  0x3e   :  { %180 = vmatpush.msrb.mxu2 %v151_v57  ;;  %v420_v57 = vld [vmem:[%s931_s2 + $0xa8] sm:$0xff] }
  0x3f   :  { %314 = vmatpush.msra.mxu0 %v252_v47  ;;  %289 = vmatpush.msra.mxu3 %v420_v57 }
  0x40   :  { %181 = vmatpush.msrb.mxu2 %v150_v59  ;;  %v806_v59 = vld [vmem:[%s931_s2 + $0x140] sm:$0xff] }
  0x9f   :  { %v112_v48 = vpop.f32.mrf.mxu1 }
  0xa4   :  { %v83_v51 = vpop.f32.mrf.mxu2 }
  0xa5   :  { %v678_v63 = vadd.f32 %v112_v48, %v83_v51  ;;  %v766_v48 = vld [vmem:[%s931_s2 + $0x158] sm:$0xff]  ;;  %v251_v51 = vld [vmem:[%s931_s2 + $0x50] sm:$0xff] }
  0xa6   :  { %451 = vmatpush.msrb.mxu1 %v766_v48  ;;  %315 = vmatpush.msra.mxu0 %v251_v51 }
  0xa7   :  { %v115_v54 = vpop.f32.mrf.mxu1  ;;  %v133_v3 = vmul.f32 %v678_v63, %v678_v63 }
  0xa8   :  { %452 = vmatpush.msrb.mxu1 %v779_v52  ;;  %316 = vmatpush.msra.mxu0 %v250_v55 }
  0xaa   :  { %453 = vmatpush.msrb.mxu1 %v793_v56 }
  0xac   :  { %v86_v58 = vpop.f32.mrf.mxu2  ;;  %454 = vmatpush.msrb.mxu1 %v806_v59 }
  0xad   :  { %v676_v62 = vadd.f32 %v115_v54, %v86_v58  ;;  %v249_v58 = vld [vmem:[%s931_s2 + $0x40] sm:$0xff] }
  0xae   :  { %317 = vmatpush.msra.mxu0 %v249_v58 }
  0xaf   :  { %v118_v60 = vpop.f32.mrf.mxu1  ;;  %v134_v1 = vmul.f32 %v676_v62, %v676_v62  ;;  %v124_v4 = vadd.f32 %v676_v62, %v678_v63 }
  0xb1   :  { %v137_v7 = vadd.f32 %v134_v1, %v133_v3  ;;  %v818_v1 = vld [vmem:[%s931_s2 + $0x138] sm:$0xff]  ;;  %v247_v3 = vld [vmem:[%s931_s2 + $0x30] sm:$0xff] }
  0xb2   :  { %455 = vmatpush.msrb.mxu1 %v818_v1 }
  0xb4   :  { %v89_v61 = vpop.f32.mrf.mxu2 }
  0xb5   :  { %v680_v0 = vadd.f32 %v118_v60, %v89_v61  ;;  %v419_v60 = vld [vmem:[%s931_s2 + $0xa0] sm:$0xff]  ;;  %v248_v61 = vld [vmem:[%s931_s2 + $0x38] sm:$0xff] }
  0xb6   :  { %290 = vmatpush.msra.mxu3 %v419_v60  ;;  %318 = vmatpush.msra.mxu0 %v248_v61 }
  0xb7   :  { %v121_v2 = vpop.f32.mrf.mxu1  ;;  %v135_v5 = vmul.f32 %v680_v0, %v680_v0  ;;  %v125_v8 = vadd.f32 %v124_v4, %v680_v0  ;;  %v830_v4 = vld [vmem:[%s931_s2 + $0x130] sm:$0xff] }
  0xb8   :  { %319 = vmatpush.msra.mxu0 %v247_v3  ;;  %456 = vmatpush.msrb.mxu1 %v830_v4 }
  0xb9   :  { %v138_v10 = vadd.f32 %v137_v7, %v135_v5  ;;  %v417_v5 = vld [vmem:[%s931_s2 + $0x90] sm:$0xff] }
  0xbc   :  { %v92_v6 = vpop.f32.mrf.mxu2 }
  0xbd   :  { %v691_v9 = vadd.f32 %v121_v2, %v92_v6  ;;  %v418_v2 = vld [vmem:[%s931_s2 + $0x98] sm:$0xff] }
  0xbe   :  { %291 = vmatpush.msra.mxu3 %v418_v2 }
  0xbf   :  { %v126_v11 = vadd.f32 %v125_v8, %v691_v9  ;;  %v136_v12 = vmul.f32 %v691_v9, %v691_v9  ;;  %v246_v8 = vld [vmem:[%s931_s2 + $0x28] sm:$0xff] }
  0xc0   :  { %292 = vmatpush.msra.mxu3 %v417_v5  ;;  %320 = vmatpush.msra.mxu0 %v246_v8 }
  0xc1   :  { %v127_v13 = vrot.slane %v126_v11, 4  ;;  %v139_v14 = vadd.f32 %v138_v10, %v136_v12  ;;  %v843_v10 = vld [vmem:[%s931_s2 + $0x128] sm:$0xff] }
  0xc2   :  { %457 = vmatpush.msrb.mxu1 %v843_v10 }
  0xc3   :  { %v128_v15 = vadd.f32 %v127_v13, %v126_v11  ;;  %v140_v16 = vrot.slane %v139_v14, 4  ;;  %v416_v11 = vld [vmem:[%s931_s2 + $0x88] sm:$0xff]  ;;  %v245_v13 = vld [vmem:[%s931_s2 + $0x20] sm:$0xff] }
  0xc4   :  { %293 = vmatpush.msra.mxu3 %v416_v11  ;;  %321 = vmatpush.msra.mxu0 %v245_v13 }
  0xc5   :  { %v129_v17 = vrot.slane %v128_v15, 2  ;;  %v141_v18 = vadd.f32 %v140_v16, %v139_v14  ;;  %v855_v14 = vld [vmem:[%s931_s2 + $0x120] sm:$0xff] }
  0xc6   :  { %458 = vmatpush.msrb.mxu1 %v855_v14 }
  0xc7   :  { %v130_v19 = vadd.f32 %v129_v17, %v128_v15  ;;  %v142_v20 = vrot.slane %v141_v18, 2  ;;  %v415_v15 = vld [vmem:[%s931_s2 + $0x80] sm:$0xff]  ;;  %v244_v17 = vld [vmem:[%s931_s2 + $0x18] sm:$0xff] }
  0xc8   :  { %294 = vmatpush.msra.mxu3 %v415_v15  ;;  %322 = vmatpush.msra.mxu0 %v244_v17 }
  0xc9   :  { %v131_v21 = vrot.slane %v130_v19, 1  ;;  %v143_v22 = vadd.f32 %v142_v20, %v141_v18  ;;  %v867_v18 = vld [vmem:[%s931_s2 + $0x118] sm:$0xff]  ;;  %v467_v20 = vmov 0.0  }
  0xca   :  { %235 = vst [vmem:[#allocation2 + $0x12] sm:$0x3f] %v467_v20  ;;  %459 = vmatpush.msrb.mxu1 %v867_v18 }
  0xcb   :  { %v144_v23 = vrot.slane %v143_v22, 1  ;;  %v132_v24 = vadd.f32 %v131_v21, %v130_v19  ;;  %v243_v19 = vld [vmem:[%s931_s2 + $0x10] sm:$0xff] }
  0xcc   :  { %v433_v21 = vld [vmem:[%s931_s2 + $0x110] sm:$0xff]  ;;  %323 = vmatpush.msra.mxu0 %v243_v19 }
  0xcd   :  { %v145_v25 = vadd.f32 %v144_v23, %v143_v22  ;;  %v242_v23 = vld [vmem:[%s931_s2 + $0x8] sm:$0xff]  ;;  %460 = vmatpush.msrb.mxu1 %v433_v21 }
  0xce   :  { %324 = vmatpush.msra.mxu0 %v242_v23 }
  0xcf   :  { %v147_v26 = vsel %vm146_vm0, %v132_v24, %v145_v25  ;;  %v432_v24 = vld [vmem:[%s931_s2 + $0x108] sm:$0xff] }
  0xd0   :  { %414 = vmatmul.msk.f32.vlgmr.msrb.gmra.mxu2 %vm148_vm1, %v147_v26  ;;  %v241_v26 = vld [vmem:[%s931_s2] sm:$0xff]  ;;  %461 = vmatpush.msrb.mxu1 %v432_v24 }
  0xd1   :  { %325 = vmatpush.msra.mxu0 %v241_v26 }
  0xd2   :  { %462 = vmatpush.msrb.mxu1 %v431_v27 }
  0xd3   :  { %363 = vmatpush.msrb.mxu0 %v714_v32 }
  0xd5   :  { %364 = vmatpush.msrb.mxu0 %v726_v36 }
  0xd7   :  { %365 = vmatpush.msrb.mxu0 %v740_v40 }
  0xd9   :  { %366 = vmatpush.msrb.mxu0 %v754_v44 }
  0xdb   :  { %367 = vmatpush.msrb.mxu0 %v766_v48 }
  0xdd   :  { %368 = vmatpush.msrb.mxu0 %v779_v52 }
  0xdf   :  { %369 = vmatpush.msrb.mxu0 %v793_v56 }
  0xe1   :  { %370 = vmatpush.msrb.mxu0 %v806_v59 }
  0xe3   :  { %371 = vmatpush.msrb.mxu0 %v818_v1  ;;  %v464_v1 = vld [vmem:[%s934_s6] ss:$0 sm:$0xff] }
  0xe5   :  { %372 = vmatpush.msrb.mxu0 %v830_v4 }
  0xe7   :  { %373 = vmatpush.msrb.mxu0 %v843_v10 }
  0xe9   :  { %374 = vmatpush.msrb.mxu0 %v855_v14 }
  0xeb   :  { %375 = vmatpush.msrb.mxu0 %v867_v18 }
  0xed   :  { %376 = vmatpush.msrb.mxu0 %v433_v21 }
  0xef   :  { %377 = vmatpush.msrb.mxu0 %v432_v24 }
  0xf1   :  { %378 = vmatpush.msrb.mxu0 %v431_v27 }
 0x153   :  { %v183_v34 = vpop.f32.mrf.mxu2 }
 0x154   :  { %v731_v38 = vmul.f32 0.001953125, %v183_v34 }
 0x156   :  { %v187_v42 = vmul.f32 %v731_v38, %v731_v38 }
 0x158   :  { %v189_v46 = vrot.slane %v187_v42, 7 }
 0x15a   :  { %v191_v50 = vsub.f32 %v731_v38, %v189_v46 }
 0x15c   :  { %v784_v54 = vadd.f32 1e-05, %v191_v50 }
 0x15e   :  { %465 = vrsqrt.f32 %v784_v54  ;;  %vm200_vm3 = vweird.f32 %v784_v54 }
 0x164   :  { %v466_v6 = vpop.eup %465 }
 0x165   :  { %v195_v7 = vmul.f32 %v466_v6, %v784_v54  ;;  %vm201_vm2 = vweird.f32 %v466_v6 }
 0x166   :  { %vm202_vm4 = vmor %vm200_vm3, %vm201_vm2 }
 0x167   :  { %v196_v12 = vmul.f32 %v466_v6, %v195_v7 }
 0x169   :  { %v197_v16 = vmul.f32 0.5, %v196_v12 }
 0x16b   :  { %v198_v22 = vsub.f32 1.5, %v197_v16 }
 0x16d   :  { %v199_v25 = vmul.f32 %v466_v6, %v198_v22 }
 0x16f   :  { %v203_v28 = vsel %vm202_vm4, %v466_v6, %v199_v25 }
 0x170   :  { %205 = vst [vmem:[#allocation1] sm:$0xff] %v203_v28 }
 0x177   :  { %v207_v30 = vld [vmem:[#allocation1 + $0x1] ss:$9 sm:$0xff] }
 0x178   :  { %v209_v31 = vmul.f32 %v207_v30, %v192_v29 }
 0x17a   :  { %v211_v32 = vmul.f32 %v209_v31, %v731_v38  ;;  %v214_v34 = vperm.slane %v209_v31, 0 }
 0x17c   :  { %v212_v35 = vsub.f32 %v210_v33, %v211_v32  ;;  %v216_v36 = vmul.f32 %v214_v34, %v678_v63  ;;  %v217_v37 = vmul.f32 %v214_v34, %v676_v62  ;;  %v218_v40 = vmul.f32 %v214_v34, %v680_v0 }
 0x17d   :  { %v219_v43 = vmul.f32 %v214_v34, %v691_v9 }
 0x17e   :  { %v221_v39 = vperm.slane %v212_v35, 0 }
 0x180   :  { %v223_v41 = vadd.f32 %v221_v39, %v216_v36  ;;  %v224_v42 = vadd.f32 %v221_v39, %v217_v37  ;;  %v225_v38 = vadd.f32 %v221_v39, %v218_v40  ;;  %v226_v44 = vadd.f32 %v221_v39, %v219_v43 }
 0x182   :  { %227 = vst [vmem:[#allocation2 + $0x1] sm:$0xff] %v223_v41  ;;  %295 = vmatmul.f32.vlgmr.msra.gmra.mxu3 %v223_v41 }
 0x183   :  { %228 = vst [vmem:[#allocation2 + $0x9] sm:$0xff] %v224_v42 }
 0x184   :  { %229 = vst [vmem:[#allocation2 - $0x1] sm:$0x2] %v223_v41 }
 0x185   :  { %230 = vst [vmem:[#allocation2 + $0xb] sm:$0x40] %v224_v42 }
 0x186   :  { %231 = vst [vmem:[#allocation2 + $0x19] sm:$0xff] %v225_v38 }
 0x187   :  { %232 = vst [vmem:[#allocation2 + $0x21] sm:$0xff] %v226_v44 }
 0x188   :  { %233 = vst [vmem:[#allocation2 + $0x17] sm:$0x2] %v225_v38 }
 0x189   :  { %234 = vst [vmem:[#allocation2 + $0x23] sm:$0x40] %v226_v44 }
 0x18a   :  { %298 = vmatmul.f32.gmra.mxu3 %v224_v42  ;;  %v237_v9 = vld [vmem:[#allocation2 + $0x8] sm:$0xff] }
 0x18b   :  { %v236_v62 = vld [vmem:[#allocation2] sm:$0xff] }
 0x18c   :  { %326 = vmatmul.f32.vlgmr.msra.gmra.mxu0 %v236_v62  ;;  %v238_v46 = vld [vmem:[#allocation2 + $0x10] sm:$0xff]  ;;  %v341_v49 = vld [vmem:[#allocation2 + $0x2] sm:$0xff] }
 0x18d   :  { %v342_v50 = vld [vmem:[#allocation2 + $0xa] sm:$0xff] }
 0x18e   :  { %v344_v63 = vld [vmem:[#allocation2 + $0x1a] sm:$0xff] }
 0x18f   :  { %387 = vmatmul.f32.vlgmr.msrb.gmra.mxu1 %v344_v63  ;;  %v259_v0 = vld [vmem:[#allocation2 + $0x11] sm:$0xff]  ;;  %v240_v48 = vld [vmem:[#allocation2 + $0x20] sm:$0xff] }
 0x190   :  { %v345_v45 = vld [vmem:[#allocation2 + $0x22] sm:$0xff]  ;;  %v239_v47 = vld [vmem:[#allocation2 + $0x18] sm:$0xff] }
 0x191   :  { %v343_v51 = vld [vmem:[#allocation2 + $0x12] sm:$0xff] }
 0x192   :  { %301 = vmatmul.f32.gmra.mxu3 %v259_v0 }
 0x194   :  { %329 = vmatmul.f32.gmra.mxu0 %v237_v9 }
 0x197   :  { %390 = vmatmul.f32.gmra.mxu1 %v345_v45 }
 0x19a   :  { %303 = vmatmul.f32.gmra.mxu3 %v225_v38 }
 0x19c   :  { %332 = vmatmul.f32.gmra.mxu0 %v238_v46 }
 0x1a2   :  { %306 = vmatmul.f32.gmra.mxu3 %v226_v44 }
 0x1a4   :  { %334 = vmatmul.f32.gmra.mxu0 %v239_v47 }
 0x1ac   :  { %337 = vmatmul.f32.gmra.mxu0 %v240_v48 }
 0x1b4   :  { %379 = vmatmul.f32.vlgmr.msrb.gmra.mxu0 %v341_v49 }
 0x1bc   :  { %382 = vmatmul.f32.gmra.mxu0 %v342_v50 }
 0x1c4   :  { %385 = vmatmul.f32.gmra.mxu0 %v343_v51 }
 0x205   :  { %v296_v52 = vpop.f32.mrf.mxu3 }
 0x209   :  { %v327_v53 = vpop.f32.mrf.mxu0 }
 0x20a   :  { %v328_v11 = vadd.f32 %v327_v53, %v296_v52 }
 0x20c   :  { %v388_v59 = vpop.f32.mrf.mxu1 }
 0x20d   :  { %v299_v54 = vpop.f32.mrf.mxu3 }
 0x211   :  { %v330_v55 = vpop.f32.mrf.mxu0 }
 0x212   :  { %v331_v15 = vadd.f32 %v330_v55, %v299_v54 }
 0x214   :  { %v391_v7 = vpop.f32.mrf.mxu1 }
 0x215   :  { %v302_v56 = vpop.f32.mrf.mxu3 }
 0x219   :  { %v333_v57 = vpop.f32.mrf.mxu0 }
 0x21d   :  { %v304_v58 = vpop.f32.mrf.mxu3 }
 0x221   :  { %v335_v60 = vpop.f32.mrf.mxu0 }
 0x222   :  { %v336_v61 = vadd.f32 %v335_v60, %v304_v58 }
 0x224   :  { %v396_v2 = vadd.f32 %v388_v59, %v336_v61 }
 0x225   :  { %v307_v5 = vpop.f32.mrf.mxu3 }
 0x226   :  { %v404_v3 = vadd.f32 %v464_v1, %v396_v2 }
 0x228   :  { %408 = vst [vmem:[%s935_s7 + $0x10] sm:$0xff] %v404_v3 }
 0x229   :  { %v338_v4 = vpop.f32.mrf.mxu0 }
 0x22a   :  { %v339_v6 = vadd.f32 %v338_v4, %v307_v5 }
 0x22c   :  { %v397_v8 = vadd.f32 %v391_v7, %v339_v6 }
 0x22e   :  { %v405_v10 = vadd.f32 %v464_v1, %v397_v8 }
 0x230   :  { %409 = vst [vmem:[%s935_s7 + $0x18] sm:$0xff] %v405_v10 }
 0x231   :  { %v380_v12 = vpop.f32.mrf.mxu0 }
 0x232   :  { %v394_v13 = vadd.f32 %v380_v12, %v328_v11 }
 0x234   :  { %v402_v14 = vadd.f32 %v464_v1, %v394_v13 }
 0x236   :  { %406 = vst [vmem:[%s935_s7] sm:$0xff] %v402_v14 }
 0x239   :  { %v383_v16 = vpop.f32.mrf.mxu0 }
 0x23a   :  { %v395_v17 = vadd.f32 %v383_v16, %v331_v15 }
 0x23c   :  { %v403_v18 = vadd.f32 %v464_v1, %v395_v17 }
 0x23e   :  { %407 = vst [vmem:[%s935_s7 + $0x8] sm:$0xff] %v403_v18 }
 0x241   :  { %v386_v19 = vpop.f32.mrf.mxu0 }

</bundles_post_ra>
